<compile_context>
chip_gen: v5e
topology: v5e:2x2
jax: 0.10.0
libtpu: 0.0.40
codegen_flags: <defaults>
</compile_context>

<pallas_src>
import numpy as np
import jax
import jax.numpy as jnp
from jax.experimental import pallas as pl
from jax.experimental.pallas import tpu as pltpu


_FOOT_FACTOR = 7   # ~ 2x(in+out) double-buffered + concat temporaries + halo + slack


def _vmem_capacity_bytes():
    try:
        info = pltpu.get_tpu_info()
        for name in ("vmem_capacity_bytes", "vmem_size_bytes", "vmem_bytes"):
            cap = getattr(info, name, None)
            if cap:
                return int(cap)
    except Exception:
        pass
    return 64 * 1024 * 1024            # conservative: v7x per-TensorCore VMEM


def _vmem_budget():
    cap = _vmem_capacity_bytes()
    budget = min(cap * 2 // 5, 72 << 20)                 # target per-step footprint
    limit = int(min(cap * 3 // 4, 2 * budget + (8 << 20)))
    limit = max(limit, 32 << 20)                          # never below the default scoped limit
    return budget, limit


def _choose_fold(H, W, c_cap):
    """Pick k >= 2 with k | H so the folded lane width C = k*W is a multiple of 128
    (lane dense) when possible and reasonably wide.  None if H has no usable divisor."""
    divs = [k for k in range(2, H + 1) if H % k == 0 and k * W <= c_cap]
    if not divs:
        return None
    dense = [k for k in divs if (k * W) % 128 == 0]
    pool = dense if dense else divs
    wide = [k for k in pool if k * W >= 256]
    return min(wide) if wide else max(pool)


def _make_kernel(C, D, TR, with_halo):
    def kernel(*refs):
        if with_halo:
            mask_ref, x_ref, halo_ref, o_ref = refs
        else:
            mask_ref, x_ref, o_ref = refs

        t = x_ref[...]                                       # (TR, C) current tile
        if with_halo:
            halo = halo_ref[...]                             # (hs, C) tail of previous tile
            top = halo[halo.shape[0] - 1:, :]                # (1, C)  previous super-row
            # The image's very first super-row has only zero padding above it.
            top = jnp.where(pl.program_id(1) == 0, jnp.zeros_like(top), top)
        else:
            top = jnp.zeros((1, C), dtype=t.dtype)

        prev = top if TR == 1 else jnp.concatenate([top, t[:TR - 1, :]], axis=0)
        # Flat shift by D = 2*W - 2 over [previous super-row ; current super-row]:
        #   shifted[I, P] = flat_x[I*C + P - D]  ==  x[i-2, j+2] for every in-image tap.
        shifted = jnp.concatenate([prev[:, C - D:], t[:, :C - D]], axis=1)
        # Zero the taps that fall right of the image (pixel column j >= W-2).
        ok = mask_ref[...] != 0                              # (1, C), broadcast over rows
        shifted = jnp.where(ok, shifted, jnp.zeros_like(shifted))
        # Single lane-dense full-tile store.
        o_ref[...] = t - shifted

    return kernel


def conv_d513(x, tile_super_rows=None):
    """Pallas TPU forward of Conv_d513: F.conv2d(x, w, padding=2) with the fixed 5x5
    kernel w[0,4] = -1, w[2,2] = 1.   x: (N, 1, H, W) -> (N, 1, H, W)."""
    assert x.ndim == 4 and x.shape[1] == 1, "Conv_d513 expects single-channel NCHW input"
    N, _, H, W = x.shape
    if H <= 2 or W <= 2:
        # Every tap of the -1 weight falls outside the image -> identity.
        return x

    dt = x.dtype
    isz = jnp.dtype(dt).itemsize
    hs = max(8, 32 // isz)             # dtype-native sublane granularity (f32 8, bf16 16, int8 32)
    budget, vmem_limit = _vmem_budget()
    c_cap = max(budget // (_FOOT_FACTOR * hs * isz), 2 * W)

    # ---- fold k image rows into one lane-dense super-row of C = k*W elements ----
    Hp = H
    k = _choose_fold(Hp, W, c_cap)
    if k is None:
        # Awkward H (e.g. large prime): pad a few zero rows so a fold exists.
        # TODO(synk): this pad costs one extra HBM round trip; only hit for awkward H.
        Hp = H + (-H) % (2 * hs)
        k = _choose_fold(Hp, W, c_cap)
    C = k * W
    R = Hp // k
    D = 2 * W - 2                      # flat offset of the -1 tap; k >= 2 ensures D < C

    row_bytes = C * isz
    max_tr = max(hs, budget // (_FOOT_FACTOR * row_bytes))

    if R % hs != 0 and _FOOT_FACTOR * R * row_bytes > budget:
        # Too big for a single block and not hs-granular: pad up instead of blowing VMEM.
        Hp += ((-R) % hs) * k
        R = Hp // k

    if R % hs == 0:
        cands = [tr for tr in range(hs, R + 1, hs) if R % tr == 0 and tr <= max_tr]
        TR = max(cands) if cands else hs
        if N == 1 and TR == R:
            # Keep >= 2 parallel grid steps so both v7x TensorCores stay busy.
            smaller = [c for c in cands if c < R]
            if smaller:
                TR = max(smaller)
    else:
        TR = R                          # small image: one full block (full-dim exemption)

    if tile_super_rows is not None:
        TR = int(tile_super_rows)
        assert R % TR == 0 and (TR == R or TR % hs == 0), (TR, R, hs)

    T = R // TR
    with_halo = T > 1

    # ---- operands ----
    x2d = x.reshape(N, H, W)
    if Hp != H:
        x2d = jnp.pad(x2d, ((0, 0), (0, Hp - H), (0, 0)))
    xf = x2d.reshape(N, R, C)           # contiguous reshape: free

    col_ok = jnp.asarray((np.arange(C) % W) < (W - 2), dtype=jnp.int32).reshape(1, C)

    in_specs = [
        pl.BlockSpec((1, C), lambda n, t: (0, 0)),            # column-validity mask (stays resident)
        pl.BlockSpec((None, TR, C), lambda n, t: (n, t, 0)),  # current tile
    ]
    operands = [col_ok, xf]
    if with_halo:
        hpt = TR // hs                                        # hs-blocks per row tile
        in_specs.append(
            pl.BlockSpec((None, hs, C),
                         lambda n, t: (n, jnp.maximum(t * hpt - 1, 0), 0)))  # prev tile tail
        operands.append(xf)

    halo_bytes = N * T * hs * C * isz if with_halo else 0
    out = pl.pallas_call(
        _make_kernel(C, D, TR, with_halo),
        out_shape=jax.ShapeDtypeStruct((N, R, C), dt),
        grid=(N, T),
        in_specs=in_specs,
        out_specs=pl.BlockSpec((None, TR, C), lambda n, t: (n, t, 0)),
        compiler_params=pltpu.CompilerParams(
            dimension_semantics=("parallel", "parallel"),
            vmem_limit_bytes=vmem_limit),
        cost_estimate=pl.CostEstimate(
            flops=N * H * W,
            transcendentals=0,
            bytes_accessed=2 * N * R * C * isz + halo_bytes + C * 4),
    )(*operands)

    out = out.reshape(N, Hp, W)
    if Hp != H:
        out = out[:, :H]
    return out.reshape(N, 1, H, W)


def _reference(x):
    x32 = x[:, 0].astype(jnp.float32)
    N, H, W = x32.shape
    xp = jnp.pad(x32, ((0, 0), (2, 2), (2, 2)))
    shifted = xp[:, 0:H, 4:4 + W]                 # x[i-2, j+2], zeros outside
    return (x32 - shifted)[:, None, :, :]


if __name__ == "__main__":
    key = jax.random.PRNGKey(0)
    k1, k2, k3, k4 = jax.random.split(key, 4)

    # 1) Small NCHW input, W unaligned to 128 -> folded lane-dense path, single tile.
    x1 = jax.random.normal(k1, (2, 1, 16, 16), dtype=jnp.float32)
    y1 = jax.block_until_ready(conv_d513(x1))
    assert y1.shape == x1.shape, y1.shape
    assert jnp.allclose(y1, _reference(x1), atol=1e-5, rtol=1e-5), "mismatch: basic"

    # 2) N=1 tall image -> super-row tiling with halo and >= 2 parallel grid steps.
    x2 = jax.random.normal(k2, (1, 1, 256, 16), dtype=jnp.float32)
    y2 = jax.block_until_ready(conv_d513(x2))
    assert jnp.allclose(y2, _reference(x2), atol=1e-5, rtol=1e-5), "mismatch: halo"

    # 3) Force small super-row tiles to exercise several halo steps (aligned W).
    x3 = jax.random.normal(k3, (1, 1, 128, 128), dtype=jnp.float32)
    y3 = jax.block_until_ready(conv_d513(x3, tile_super_rows=8))
    assert jnp.allclose(y3, _reference(x3), atol=1e-5, rtol=1e-5), "mismatch: tiled"

    # 4) bf16 path (16-row sublane granularity).
    x4 = jax.random.normal(k4, (2, 1, 128, 32), dtype=jnp.bfloat16)
    y4 = jax.block_until_ready(conv_d513(x4))
    assert jnp.allclose(y4.astype(jnp.float32), _reference(x4), atol=5e-2, rtol=5e-2), "mismatch: bf16"

    print("KERNEL_OK")
</pallas_src>

<mosaic_0001>
module attributes {stable_mosaic.version = 11 : i64} {
  func.func @kernel(%arg0: i32, %arg1: i32, %arg2: memref<1x256xi32, #tpu.memory_space<vmem>>, %arg3: memref<1x1x256xf32, #tpu.memory_space<vmem>>, %arg4: memref<1x1x256xf32, #tpu.memory_space<vmem>>) attributes {dimension_semantics = [#tpu.dimension_semantics<parallel>, #tpu.dimension_semantics<parallel>], iteration_bounds = array<i64: 2, 1>, scalar_prefetch = 0 : i64, scratch_operands = 0 : i64, tpu.core_type = #tpu.core_type<tc>, window_params = [{pipeline_mode = #tpu.pipeline_mode<synchronous>, transform_indices = @transform_0, window_bounds = array<i64: 1, 256>}, {transform_indices = @transform_1, window_bounds = array<i64: 1, 1, 256>}, {transform_indices = @transform_2, window_bounds = array<i64: 1, 1, 256>}]} {
    %c0 = arith.constant 0 : index
    %c0_0 = arith.constant 0 : index
    %c0_1 = arith.constant 0 : index
    %0 = vector.load %arg3[%c0, %c0_0, %c0_1] : memref<1x1x256xf32, #tpu.memory_space<vmem>>, vector<1x1x256xf32>
    %1 = vector.shape_cast %0 : vector<1x1x256xf32> to vector<1x256xf32>
    %cst = arith.constant 0.000000e+00 : f32
    %2 = vector.broadcast %cst : f32 to vector<1x256xf32>
    %3 = vector.extract_strided_slice %2 {offsets = [0, 226], sizes = [1, 30], strides = [1, 1]} : vector<1x256xf32> to vector<1x30xf32>
    %4 = vector.extract_strided_slice %1 {offsets = [0, 0], sizes = [1, 226], strides = [1, 1]} : vector<1x256xf32> to vector<1x226xf32>
    %5 = tpu.concatenate %3, %4 in 1 : vector<1x30xf32>, vector<1x226xf32> -> vector<1x256xf32>
    %c0_2 = arith.constant 0 : index
    %c0_3 = arith.constant 0 : index
    %6 = vector.load %arg2[%c0_2, %c0_3] : memref<1x256xi32, #tpu.memory_space<vmem>>, vector<1x256xi32>
    %c0_i32 = arith.constant 0 : i32
    %7 = vector.broadcast %c0_i32 : i32 to vector<1x256xi32>
    %8 = arith.cmpi ne, %6, %7 : vector<1x256xi32>
    %cst_4 = arith.constant 0.000000e+00 : f32
    %9 = vector.broadcast %cst_4 : f32 to vector<1x256xf32>
    %10 = arith.select %8, %5, %9 : vector<1x256xi1>, vector<1x256xf32>
    %11 = arith.subf %1, %10 : vector<1x256xf32>
    %c0_5 = arith.constant 0 : index
    %c0_6 = arith.constant 0 : index
    %c0_7 = arith.constant 0 : index
    %12 = vector.load %arg4[%c0_5, %c0_6, %c0_7] : memref<1x1x256xf32, #tpu.memory_space<vmem>>, vector<1x1x256xf32>
    %13 = vector.shape_cast %12 : vector<1x1x256xf32> to vector<1x256xf32>
    %14 = vector.shape_cast %11 : vector<1x256xf32> to vector<1x1x256xf32>
    tpu.vector_store %arg4[%c0_5, %c0_6, %c0_7], %14 {strides = array<i32>} : memref<1x1x256xf32, #tpu.memory_space<vmem>>, vector<1x1x256xf32>,
    return
  }
  func.func @transform_0(%arg0: i32, %arg1: i32) -> (i32, i32) {
    %c0_i32 = arith.constant 0 : i32
    %c0_i32_0 = arith.constant 0 : i32
    %c0_i32_1 = arith.constant 0 : i32
    return %c0_i32, %c0_i32_0 : i32, i32
  }
  func.func @transform_1(%arg0: i32, %arg1: i32) -> (i32, i32, i32) {
    %c0_i32 = arith.constant 0 : i32
    %c0_i32_0 = arith.constant 0 : i32
    return %arg0, %arg1, %c0_i32 : i32, i32, i32
  }
  func.func @transform_2(%arg0: i32, %arg1: i32) -> (i32, i32, i32) {
    %c0_i32 = arith.constant 0 : i32
    %c0_i32_0 = arith.constant 0 : i32
    return %arg0, %arg1, %c0_i32 : i32, i32, i32
  }
}

</mosaic_0001>

<bundles_post_ra>
// kernel: tpu_custom_call.1
= control target key start
LH: loop header
LB: loop body
LE: loop exit
PB: predicated region body
PF: predicated region fallthrough
CT: control target
= control target key end

     0   :  { %7 = vsyncpa [#allocation3], 0  ;;  %s735_s0 = inlined_call_operand.hbm [shape: s32[1,256], index: 0, kind: input, shape index: {}]   ;;  %s736_s1 = inlined_call_operand.hbm [shape: f32[2,1,256], index: 1, kind: input, shape index: {}]   ;;  %s737_s2 = inlined_call_operand.hbm [shape: f32[2,1,256], index: 2, kind: output, shape index: {}]  }
   0x1   :  { %8 = vsyncpa [#allocation6], 0 }
   0x2   :  { %10 = vsyncpa [#allocation6 + $0x1], 0 }
   0x3   :  { %11 = vsyncpa [#allocation4], 0 }
   0x4   :  { %13 = vsyncpa [#allocation4 + $0x1], 0  ;;  %s586_s9 = smov 0   ;;  %s588_s10 = smov 0  }
   0x5   :  { %s590_s11 = smov 0   ;;  %s592_s12 = smov 0  }
   0x6   :  { %s594_s13 = smov 0   ;;  %s596_s14 = smov 0  }
   0x7 LB: > { %s332_s15 = sadd.s32 4294967295, %s567_s14   ;;  %s333_s16 = sadd.s32 4294967294, %s567_s14   ;;  %s567_s14 = sphi %s596_s14, %s19_s14   ;;  %s563_s13 = sphi %s594_s13, %s749_s13   ;;  %s559_s12 = sphi %s592_s12, %s748_s12   ;;  %s555_s11 = sphi %s590_s11, %s747_s11   ;;  %s551_s10 = sphi %s588_s10, %s746_s10   ;;  %s547_s9 = sphi %s586_s9, %s745_s9  }
   0x8   : > { %p74_p0 = scmp.ne.s32.totalorder %s551_s10, %s547_s9  ;;  %p620_p1 = scmp.eq.s32.totalorder %s332_s15, 0 }
   0x9   : > { %p624_p2 = scmp.eq.s32.totalorder %s332_s15, 1  ;;  %p106_p3 = scmp.eq.s32.totalorder %s333_s16, 1 }
   0xa   : > { %p630_p4 = por %p620_p1, %p74_p0  ;;  %p334_p5 = scmp.ge.s32.totalorder %s567_s14, 1 }
   0xb   : > { %p635_p6 = por %p106_p3, %p74_p0  ;;  %p113_p7 = scmp.lt.s32.totalorder %s567_s14, 3 }
   0xc   : > { %s125_s23 = sshll.u32 %s735_s0, 4  ;;  %p336_p9 = scmp.ge.s32.totalorder %s567_s14, 2  ;;  %s126_s23 = int_to_ptr.hbm [resolvable:$true] %s125_s23 }
   0xd   : > { %p643_p8 = pnand %p334_p5, %p113_p7  ;;  %s569_s25 = smov [#allocation2]  }
   0xe   : > { %s127_s26 = sshll.u32 %s569_s25, 4  ;;  %s31_s27 = sadd.s32 1, %s563_s13  ;;  %s128_s26 = int_to_ptr.vmem [resolvable:$true] %s127_s26 }
   0xf   : > { %p355_p10 = pneg %p643_p8  ;;  %p33_p12 = scmp.ge.s32.totalorder %s31_s27, 2 }
  0x10   : > { %s61_s28 = sadd.s32 1, %s555_s11  ;;  %p68_p13 = scmp.ne.s32.totalorder %s555_s11, %s551_s10 }
  0x11   : > { %p356_p11 = pnand %p355_p10, %p620_p1  ;;  %p69_p0 = scmp.eq.s32.totalorder %s567_s14, 0 }
  0x12   : > { %s751_s27 = smov (%p33_p12, %s31_s27), 0  ;;  %p665_p5 = por %p624_p2, %p68_p13 }
  0x13   : > { %358 = dma.hbm_to_vmem [thread:$0]  (!%p356_p11), %s126_s23, 32, %s128_s26, [#allocation3]  }
  0x14   : > { %p659_p3 = por %p69_p0, %p68_p13  ;;  %s56_s3 = ssub.s32 %s563_s13, %s751_s27 }
  0x15   : > { %p368_p7 = scmp.lt.s32.totalorder %s567_s14, 2  ;;  %p59_p10 = scmp.eq.s32.totalorder %s56_s3, 0 }
  0x16   : > { %s138_s4 = sand.u32 1, %s555_s11   ;;  %s338_s7 = sshll.u32 %s563_s13, 1 }
  0x17   : > { %s337_s5 = sshll.u32 %s138_s4, 1  ;;  %s148_s16 = scalar_lea.hbm %s736_s1, %s338_s7 }
  0x18   : > { %s674_s6 = scalar_select %p59_p10, %s555_s11, %s61_s28  }
  0x19   : > { %s142_s21 = scalar_lea.vmem [#allocation5], %s337_s5  ;;  %s150_s18 = sshll.u32 %s148_s16, 4  ;;  %s151_s18 = int_to_ptr.hbm [resolvable:$true] %s150_s18 }
  0x1a   : > { %s152_s22 = sshll.u32 %s142_s21, 4  ;;  %p360_p2 = pnand %p368_p7, %p659_p3  ;;  %s153_s22 = int_to_ptr.vmem [resolvable:$true] %s152_s22 }
  0x1b   : > { %s139_s23 = scalar_lea.sflag [#allocation6], %s138_s4  ;;  %161 = sbr.rel (%p643_p8) target bundleno = 173 (0xad), region = 28 }
  0x1c   : > { %362 = dma.hbm_to_vmem [thread:$0]  (!%p360_p2), %s151_s18, 32, %s153_s22, %s139_s23  }
  0x20   : > { %534 = dma.done.wait (%p620_p1), [#allocation3], 32  }
  0x21   : > { %536 = vsyncadd (%p620_p1), [#allocation3], 4294967264  ;;  %s689_s25 = sand.u32 1, %s551_s10  }
  0x22   : > { %s341_s26 = sshll.u32 %s689_s25, 1  ;;  %s169_s28 = scalar_lea.sflag [#allocation6], %s689_s25 }
  0x23   : > { %s172_s29 = scalar_lea.vmem [#allocation5], %s341_s26 }
  0x24   : > { %538 = dma.done.wait (%p630_p4), %s169_s28, 32  }
  0x25   : > { %540 = vsyncadd (%p630_p4), %s169_s28, 4294967264  ;;  %v194_v0 = vld [vmem:[%s172_s29] sm:$0x3]  ;;  %s570_s24 = smov 30   ;;  %s344_s17 = sshll.u32 %s559_s12, 1  ;;  %vm202_vm0 = vcmask 244736   ;;  %v215_v7 = vlaneseq }
  0x26   : > { %v196_v1 = vperm.slane %v194_v0, 0  ;;  %v197_v2 = vperm.slane %v194_v0, 1  ;;  %v206_v4 = vld [vmem:[#allocation2] sm:$0x3]  ;;  %s233_s5 = scalar_lea.hbm %s737_s2, %s344_s17  ;;  %vm210_vm1 = vcmask 1040384   ;;  %s193_s19 = scalar_lea.vmem [#allocation7], %s341_s26 }
  0x27   : > { %vm207_vm2 = vcmp.ne.s32.totalorder %v206_v4, 0  ;;  %s235_s7 = sshll.u32 %s193_s19, 4  ;;  %s237_s8 = sshll.u32 %s233_s5, 4  ;;  %vm217_vm3 = vcmp.lt.s32.totalorder %v215_v7, 256  ;;  %s236_s7 = int_to_ptr.vmem [resolvable:$true] %s235_s7  ;;  %s238_s8 = int_to_ptr.hbm [resolvable:$true] %s237_s8 }
  0x28   : > { %198 = vrot.lane.b32.xlu0 %v196_v1, %s570_s24  ;;  %s221_s12 = scalar_lea.sflag [#allocation4], %s689_s25  ;;  %s495_s15 = sshra.s32 %s238_s8, 4  ;;  %s496_s15 = int_to_ptr.hbm [resolvable:$true] %s495_s15 }
  0x29   : > { %s497_s16 = scalar_lea.hbm %s496_s15, 2  ;;  %s501_s18 = scalar_lea.hbm %s737_s2, 4 }
  0x2a   : > { %p498_p1 = scmp.ne.s32.totalorder %s496_s15, %s497_s16  ;;  %p502_p11 = scmp.lt.s32.totalorder %s496_s15, %s737_s2 }
  0x2b   : > { %p503_p12 = scmp.lt.s32.totalorder %s501_s18, %s497_s16 }
  0x2c   : > { %p499_p4 = pnand %p498_p1, %p665_p5 }
  0x2d   : > { %p504_p13 = por %p503_p12, %p502_p11 }
  0x2e   : > { %p500_p8 = pneg %p499_p4 }
  0x30   : > { %200 = vrot.lane.b32.xlu0 %v197_v2, %s570_s24  ;;  %p505_p0 = pnand %p504_p13, %p500_p8 }
  0x9a   : > { %v199_v3 = vpop.permute.xlu0 %198 }
  0x9b   : > { %v205_v9 = vsel %vm202_vm0, 0.0, %v199_v3 }
  0xa2   : > { %v201_v5 = vpop.permute.xlu0 %200 }
  0xa3   : > { %v203_v6 = vsel %vm202_vm0, %v199_v3, %v201_v5 }
  0xa4   : > { %v209_v8 = vrot.slane %v203_v6, 7 }
  0xa6   : > { %v211_v10 = vsel %vm210_vm1, %v205_v9, %v209_v8 }
  0xa7   : > { %v213_v11 = vsel %vm207_vm2, %v211_v10, 0.0 }
  0xa8   : > { %v214_v12 = vsub.f32 %v194_v0, %v213_v11 }
  0xaa   : > { %219 = vst.msk [vmem:[%s193_s19] sm:$0x3] %vm217_vm3, %v214_v12 }
  0xab   : > { %508 = shalt.err (!%p505_p0)
}
  0xac   : > { %353 = dma.vmem_to_hbm [thread:$0]  (%p665_p5), %s236_s7, 32, %s238_s8, %s221_s12  }
  0xad PF: > { %s249_s25 = sand.u32 1, %s547_s9   ;;  %p364_p3 = pnand %p336_p9, %p635_p6 }
  0xae   : > { %s250_s28 = scalar_lea.sflag [#allocation4], %s249_s25 }
  0xaf   : > { %p365_p7 = pneg %p364_p3 }
  0xb1   : > { %542 = dma.done.wait (%p365_p7), %s250_s28, 32  }
  0xb2   : > { %544 = vsyncadd (%p365_p7), %s250_s28, 4294967264  ;;  %s19_s14 = sadd.s32 1, %s567_s14   ;;  %s745_s9 = smov %s551_s10 }
  0xb3   : > { %p16_p10 = scmp.ge.s32.totalorder %s19_s14, 4   ;;  %s746_s10 = smov %s555_s11 }
  0xb4   : > { %s747_s11 = smov %s674_s6  ;;  %s748_s12 = smov %s563_s13 }
  0xb5   : > { %s749_s13 = smov %s751_s27  ;;  %18 = sbr.rel (!%p16_p10) target bundleno = 7 (0x7), region = 78 }
  0xba   :  { %256 = vsyncpa [#allocation3], 1 }
  0xbb   :  { %258 = vsyncpa [#allocation3 + $0x1], 1 }
  0xbc   :  { %259 = vsyncpa [#allocation6], 1 }
  0xbd   :  { %261 = vsyncpa [#allocation6 + $0x1], 1 }
  0xbe   :  { %262 = vsyncpa [#allocation4], 1 }
  0xbf   :  { %264 = vsyncpa [#allocation4 + $0x1], 1 }

</bundles_post_ra>
